<compile_context>
chip_gen: v7x
topology: tpu7x:2x2x1
jax: 0.10.0
libtpu: 0.0.40
codegen_flags: <defaults>
</compile_context>

<pallas_src>
import math

import jax
import jax.numpy as jnp
from jax.experimental import pallas as pl
from jax.experimental.pallas import tpu as pltpu


def _round_up(n, m):
    return ((n + m - 1) // m) * m


def _device_tuning():
    """Pick (epilogue dtype, max batch tile) for the local TPU generation."""
    try:
        kind = jax.devices()[0].device_kind.lower()
    except Exception:  # no devices visible at trace time -> conservative default
        kind = ""
    if any(g in kind for g in ("v2", "v3", "v4", "v5")):
        # Pre-v6 VPU has no bf16 path: keep bias-add/ReLU in f32 and prefer
        # moderate tiles (single vst slot, 4x128 MXU).
        return jnp.float32, 4096
    # v6e / v7x: bf16 VPU -> bf16 epilogue; cap tiles for v7x's 64 MiB VMEM.
    return jnp.bfloat16, 8192


def _pick_tile_b(B, tile_b_max, target_steps=16):
    """Batch tile: multiple of 128 lanes, ~target_steps grid steps, capped."""
    b128 = _round_up(B, 128)
    tile = _round_up(-(-b128 // target_steps), 128)
    return max(128, min(tile, tile_b_max, b128))


def _resident(shape):
    # Whole-array block with a constant index_map: DMA'd once before step 0 and
    # VMEM-resident for the whole grid.
    return pl.BlockSpec(shape, lambda i: (0, 0))


def qnet_kernel(xT_ref, w1_ref, b12_ref, w2_ref, w3_ref, b3_ref, oT_ref,
                h1_ref, h2_ref):
    """One batch tile, feature-major layout.

    xT_ref  : [state_dim, tile_b]   f32   (batch on the 128-lane axis)
    wN_ref  : [out_features, in_features] bf16  (PyTorch nn.Linear layout)
    b12_ref : [hidden, 2]           f32   (packed fc1/fc2 biases)
    b3_ref  : [action_dim, 1]       f32
    oT_ref  : [action_dim, tile_b]  f32
    h1/h2   : [hidden, tile_b] VMEM scratch in the epilogue dtype.
    """
    mm = w1_ref.dtype      # MXU operand dtype (bf16)
    act = h1_ref.dtype     # epilogue dtype: bf16 (v6e/v7x) or f32 (v5 and older)

    xT = xT_ref[...].astype(mm)                       # [S, T]
    b1 = b12_ref[:, 0:1].astype(act)                  # [H, 1]
    b2 = b12_ref[:, 1:2].astype(act)                  # [H, 1]

    # fc1 + ReLU   (MXU accumulates in f32; bias/ReLU in `act`)
    h1 = jnp.dot(w1_ref[...], xT, preferred_element_type=jnp.float32)
    h1_ref[...] = jnp.maximum(h1.astype(act) + b1, 0)

    # fc2 + ReLU
    h2 = jnp.dot(w2_ref[...], h1_ref[...].astype(mm),
                 preferred_element_type=jnp.float32)
    h2_ref[...] = jnp.maximum(h2.astype(act) + b2, 0)

    # fc3 (no activation), bias-add in f32
    out = jnp.dot(w3_ref[...], h2_ref[...].astype(mm),
                  preferred_element_type=jnp.float32)
    oT_ref[...] = (out + b3_ref[...]).astype(oT_ref.dtype)


def qnetwork_forward_t(xT, params, *, tile_b=None, act_dtype=None):
    """Feature-major forward: xT [state_dim, B] f32 -> [action_dim, B] f32.

    This is the preferred entry point: no host-side transposes or padding ops.
    """
    state_dim, B = xT.shape
    hidden = params["w1"].shape[0]
    action_dim = params["w3"].shape[0]

    auto_act, tile_b_max = _device_tuning()
    if act_dtype is None:
        act_dtype = auto_act
    if tile_b is None:
        tile_b = _pick_tile_b(B, tile_b_max)
    else:
        tile_b = max(128, _round_up(tile_b, 128))

    grid = (pl.cdiv(B, tile_b),)

    # Per-step VMEM (tile_b=8192, bf16 epilogue): h1+h2 scratch 4 MiB, double-buffered
    # x/out tiles ~0.5 MiB, resident weights ~0.2 MiB -> well under the 32 MiB scoped
    # default on all of v5e/v6e/v7x, so no vmem_limit_bytes override is needed.
    oT = pl.pallas_call(
        qnet_kernel,
        out_shape=jax.ShapeDtypeStruct((action_dim, B), jnp.float32),
        grid=grid,
        in_specs=[
            pl.BlockSpec((state_dim, tile_b), lambda i: (0, i)),   # x^T batch tile
            _resident((hidden, state_dim)),                        # w1
            _resident((hidden, 2)),                                # b1|b2 packed
            _resident((hidden, hidden)),                           # w2
            _resident((action_dim, hidden)),                       # w3
            _resident((action_dim, 1)),                            # b3
        ],
        out_specs=pl.BlockSpec((action_dim, tile_b), lambda i: (0, i)),
        scratch_shapes=[
            pltpu.VMEM((hidden, tile_b), act_dtype),               # h1
            pltpu.VMEM((hidden, tile_b), act_dtype),               # h2
        ],
        compiler_params=pltpu.CompilerParams(
            dimension_semantics=("parallel",),   # batch tiles shard across TCs on v7x
        ),
    )(xT, params["w1"], params["b12"], params["w2"], params["w3"], params["b3"])
    return oT


def qnetwork_forward(x, params, **kw):
    """PyTorch-layout compat shim: x [B, state_dim] -> [B, action_dim].

    Prefer `qnetwork_forward_t` (feature-major end-to-end) to avoid the two
    host-side transposes this shim introduces.
    """
    return qnetwork_forward_t(x.T, params, **kw).T


def init_qnetwork_params(key, state_dim, action_dim, hidden=128,
                         matmul_dtype=jnp.bfloat16):
    """nn.Linear default init U[-1/sqrt(fan_in), +1/sqrt(fan_in)].

    Weights stored PyTorch-style [out_features, in_features] in bf16 (MXU operands);
    fc1/fc2 biases packed into one [hidden, 2] f32 array, fc3 bias [action_dim, 1] f32.
    """
    keys = jax.random.split(key, 6)

    def linear(kw_, kb, fan_in, fan_out):
        bound = 1.0 / math.sqrt(fan_in)
        w = jax.random.uniform(kw_, (fan_out, fan_in), jnp.float32, -bound, bound)
        b = jax.random.uniform(kb, (fan_out,), jnp.float32, -bound, bound)
        return w.astype(matmul_dtype), b

    w1, b1 = linear(keys[0], keys[1], state_dim, hidden)
    w2, b2 = linear(keys[2], keys[3], hidden, hidden)
    w3, b3 = linear(keys[4], keys[5], hidden, action_dim)
    return {
        "w1": w1, "w2": w2, "w3": w3,
        "b12": jnp.stack([b1, b2], axis=1),    # [hidden, 2] f32
        "b3": b3[:, None],                     # [action_dim, 1] f32
    }


def qnetwork_ref(x, p, act_dtype=jnp.float32):
    """Pure-JAX reference mirroring the kernel numerics exactly:
    bf16 MXU operands, f32 accumulation, bias-add/ReLU in `act_dtype`."""
    mm = p["w1"].dtype
    b1 = p["b12"][:, 0].astype(act_dtype)
    b2 = p["b12"][:, 1].astype(act_dtype)
    b3 = p["b3"][:, 0]

    h = x.astype(mm)
    h = jnp.dot(h, p["w1"].T, preferred_element_type=jnp.float32)
    h = jnp.maximum(h.astype(act_dtype) + b1, 0).astype(mm)
    h = jnp.dot(h, p["w2"].T, preferred_element_type=jnp.float32)
    h = jnp.maximum(h.astype(act_dtype) + b2, 0).astype(mm)
    h = jnp.dot(h, p["w3"].T, preferred_element_type=jnp.float32)
    return h + b3


if __name__ == "__main__":
    key = jax.random.PRNGKey(0)
    k_param, k_x = jax.random.split(key)

    state_dim = 4      # CartPole-style observation
    action_dim = 2
    batch = 8

    params = init_qnetwork_params(k_param, state_dim, action_dim)
    x = jax.random.normal(k_x, (batch, state_dim), jnp.float32)

    act_dtype, _ = _device_tuning()

    # Primary feature-major path (no host-side layout ops).
    qT = qnetwork_forward_t(jnp.asarray(x.T), params)
    qT = jax.block_until_ready(qT)

    # PyTorch-layout compat path.
    q = qnetwork_forward(x, params)
    q = jax.block_until_ready(q)

    ref = qnetwork_ref(x, params, act_dtype)
    assert qT.shape == (action_dim, batch)
    assert q.shape == (batch, action_dim)
    err_t = float(jnp.max(jnp.abs(qT.T - ref)))
    err_b = float(jnp.max(jnp.abs(q - ref)))
    assert err_t < 2e-3 and err_b < 2e-3, (err_t, err_b)

    print("KERNEL_OK")
</pallas_src>

<mosaic_0001>
module attributes {stable_mosaic.version = 11 : i64} {
  func.func @qnet_kernel(%arg0: i32, %arg1: memref<4x128xf32, #tpu.memory_space<vmem>>, %arg2: memref<128x4xbf16, #tpu.memory_space<vmem>>, %arg3: memref<128x2xf32, #tpu.memory_space<vmem>>, %arg4: memref<128x128xbf16, #tpu.memory_space<vmem>>, %arg5: memref<2x128xbf16, #tpu.memory_space<vmem>>, %arg6: memref<2x1xf32, #tpu.memory_space<vmem>>, %arg7: memref<2x128xf32, #tpu.memory_space<vmem>>, %arg8: memref<128x128xbf16, #tpu.memory_space<vmem>>, %arg9: memref<128x128xbf16, #tpu.memory_space<vmem>>) attributes {dimension_semantics = [#tpu.dimension_semantics<parallel>], iteration_bounds = array<i64: 1>, scalar_prefetch = 0 : i64, scratch_operands = 2 : i64, tpu.core_type = #tpu.core_type<tc>, window_params = [{transform_indices = @transform_0, window_bounds = array<i64: 4, 128>}, {pipeline_mode = #tpu.pipeline_mode<synchronous>, transform_indices = @transform_1, window_bounds = array<i64: 128, 4>}, {pipeline_mode = #tpu.pipeline_mode<synchronous>, transform_indices = @transform_2, window_bounds = array<i64: 128, 2>}, {pipeline_mode = #tpu.pipeline_mode<synchronous>, transform_indices = @transform_3, window_bounds = array<i64: 128, 128>}, {pipeline_mode = #tpu.pipeline_mode<synchronous>, transform_indices = @transform_4, window_bounds = array<i64: 2, 128>}, {pipeline_mode = #tpu.pipeline_mode<synchronous>, transform_indices = @transform_5, window_bounds = array<i64: 2, 1>}, {transform_indices = @transform_6, window_bounds = array<i64: 2, 128>}]} {
    %c0 = arith.constant 0 : index
    %c0_0 = arith.constant 0 : index
    %0 = vector.load %arg1[%c0, %c0_0] : memref<4x128xf32, #tpu.memory_space<vmem>>, vector<4x128xf32>
    %1 = arith.truncf %0 : vector<4x128xf32> to vector<4x128xbf16>
    %c0_1 = arith.constant 0 : index
    %c0_2 = arith.constant 0 : index
    %2 = vector.load %arg3[%c0_1, %c0_2] : memref<128x2xf32, #tpu.memory_space<vmem>>, vector<128x1xf32>
    %3 = arith.truncf %2 : vector<128x1xf32> to vector<128x1xbf16>
    %c0_3 = arith.constant 0 : index
    %c1 = arith.constant 1 : index
    %4 = vector.load %arg3[%c0_3, %c1] : memref<128x2xf32, #tpu.memory_space<vmem>>, vector<128x1xf32>
    %5 = arith.truncf %4 : vector<128x1xf32> to vector<128x1xbf16>
    %c0_4 = arith.constant 0 : index
    %c0_5 = arith.constant 0 : index
    %6 = vector.load %arg2[%c0_4, %c0_5] : memref<128x4xbf16, #tpu.memory_space<vmem>>, vector<128x4xbf16>
    %cst = arith.constant dense<0.000000e+00> : vector<128x128xf32>
    %7 = tpu.matmul %6, %1, %cst {dimension_numbers = #tpu.dot_dimension_numbers<[1], [0], [0], [1], [0, 0, 1, 1], [], []>} : vector<128x4xbf16>, vector<4x128xbf16>, vector<128x128xf32> -> vector<128x128xf32>
    %8 = arith.truncf %7 : vector<128x128xf32> to vector<128x128xbf16>
    %9 = vector.broadcast %3 : vector<128x1xbf16> to vector<128x128xbf16>
    %10 = arith.addf %8, %9 : vector<128x128xbf16>
    %cst_6 = arith.constant 0.000000e+00 : bf16
    %11 = vector.broadcast %cst_6 : bf16 to vector<128x128xbf16>
    %12 = arith.maximumf %10, %11 : vector<128x128xbf16>
    %c0_7 = arith.constant 0 : index
    %c0_8 = arith.constant 0 : index
    %13 = vector.load %arg8[%c0_7, %c0_8] : memref<128x128xbf16, #tpu.memory_space<vmem>>, vector<128x128xbf16>
    tpu.vector_store %arg8[%c0_7, %c0_8], %12 {strides = array<i32>} : memref<128x128xbf16, #tpu.memory_space<vmem>>, vector<128x128xbf16>,
    %c0_9 = arith.constant 0 : index
    %c0_10 = arith.constant 0 : index
    %14 = vector.load %arg4[%c0_9, %c0_10] : memref<128x128xbf16, #tpu.memory_space<vmem>>, vector<128x128xbf16>
    %c0_11 = arith.constant 0 : index
    %c0_12 = arith.constant 0 : index
    %15 = vector.load %arg8[%c0_11, %c0_12] : memref<128x128xbf16, #tpu.memory_space<vmem>>, vector<128x128xbf16>
    %cst_13 = arith.constant dense<0.000000e+00> : vector<128x128xf32>
    %16 = tpu.matmul %14, %15, %cst_13 {dimension_numbers = #tpu.dot_dimension_numbers<[1], [0], [0], [1], [0, 0, 1, 1], [], []>} : vector<128x128xbf16>, vector<128x128xbf16>, vector<128x128xf32> -> vector<128x128xf32>
    %17 = arith.truncf %16 : vector<128x128xf32> to vector<128x128xbf16>
    %18 = vector.broadcast %5 : vector<128x1xbf16> to vector<128x128xbf16>
    %19 = arith.addf %17, %18 : vector<128x128xbf16>
    %cst_14 = arith.constant 0.000000e+00 : bf16
    %20 = vector.broadcast %cst_14 : bf16 to vector<128x128xbf16>
    %21 = arith.maximumf %19, %20 : vector<128x128xbf16>
    %c0_15 = arith.constant 0 : index
    %c0_16 = arith.constant 0 : index
    %22 = vector.load %arg9[%c0_15, %c0_16] : memref<128x128xbf16, #tpu.memory_space<vmem>>, vector<128x128xbf16>
    tpu.vector_store %arg9[%c0_15, %c0_16], %21 {strides = array<i32>} : memref<128x128xbf16, #tpu.memory_space<vmem>>, vector<128x128xbf16>,
    %c0_17 = arith.constant 0 : index
    %c0_18 = arith.constant 0 : index
    %23 = vector.load %arg5[%c0_17, %c0_18] : memref<2x128xbf16, #tpu.memory_space<vmem>>, vector<2x128xbf16>
    %c0_19 = arith.constant 0 : index
    %c0_20 = arith.constant 0 : index
    %24 = vector.load %arg9[%c0_19, %c0_20] : memref<128x128xbf16, #tpu.memory_space<vmem>>, vector<128x128xbf16>
    %cst_21 = arith.constant dense<0.000000e+00> : vector<2x128xf32>
    %25 = tpu.matmul %23, %24, %cst_21 {dimension_numbers = #tpu.dot_dimension_numbers<[1], [0], [0], [1], [0, 0, 1, 1], [], []>} : vector<2x128xbf16>, vector<128x128xbf16>, vector<2x128xf32> -> vector<2x128xf32>
    %c0_22 = arith.constant 0 : index
    %c0_23 = arith.constant 0 : index
    %26 = vector.load %arg6[%c0_22, %c0_23] : memref<2x1xf32, #tpu.memory_space<vmem>>, vector<2x1xf32>
    %27 = vector.broadcast %26 : vector<2x1xf32> to vector<2x128xf32>
    %28 = arith.addf %25, %27 : vector<2x128xf32>
    %c0_24 = arith.constant 0 : index
    %c0_25 = arith.constant 0 : index
    %29 = vector.load %arg7[%c0_24, %c0_25] : memref<2x128xf32, #tpu.memory_space<vmem>>, vector<2x128xf32>
    tpu.vector_store %arg7[%c0_24, %c0_25], %28 {strides = array<i32>} : memref<2x128xf32, #tpu.memory_space<vmem>>, vector<2x128xf32>,
    return
  }
  func.func @transform_0(%arg0: i32) -> (i32, i32) {
    %c0_i32 = arith.constant 0 : i32
    %c0_i32_0 = arith.constant 0 : i32
    return %c0_i32, %arg0 : i32, i32
  }
  func.func @transform_1(%arg0: i32) -> (i32, i32) {
    %c0_i32 = arith.constant 0 : i32
    %c0_i32_0 = arith.constant 0 : i32
    %c0_i32_1 = arith.constant 0 : i32
    return %c0_i32, %c0_i32_0 : i32, i32
  }
  func.func @transform_2(%arg0: i32) -> (i32, i32) {
    %c0_i32 = arith.constant 0 : i32
    %c0_i32_0 = arith.constant 0 : i32
    %c0_i32_1 = arith.constant 0 : i32
    return %c0_i32, %c0_i32_0 : i32, i32
  }
  func.func @transform_3(%arg0: i32) -> (i32, i32) {
    %c0_i32 = arith.constant 0 : i32
    %c0_i32_0 = arith.constant 0 : i32
    %c0_i32_1 = arith.constant 0 : i32
    return %c0_i32, %c0_i32_0 : i32, i32
  }
  func.func @transform_4(%arg0: i32) -> (i32, i32) {
    %c0_i32 = arith.constant 0 : i32
    %c0_i32_0 = arith.constant 0 : i32
    %c0_i32_1 = arith.constant 0 : i32
    return %c0_i32, %c0_i32_0 : i32, i32
  }
  func.func @transform_5(%arg0: i32) -> (i32, i32) {
    %c0_i32 = arith.constant 0 : i32
    %c0_i32_0 = arith.constant 0 : i32
    %c0_i32_1 = arith.constant 0 : i32
    return %c0_i32, %c0_i32_0 : i32, i32
  }
  func.func @transform_6(%arg0: i32) -> (i32, i32) {
    %c0_i32 = arith.constant 0 : i32
    %c0_i32_0 = arith.constant 0 : i32
    return %c0_i32, %arg0 : i32, i32
  }
}

</mosaic_0001>

<bundles_post_ra>
// kernel: tpu_custom_call.1
= control target key start
LH: loop header
LB: loop body
LE: loop exit
PB: predicated region body
PF: predicated region fallthrough
CT: control target
= control target key end

     0   :  { %vm132_vm0 = vcmask 1041408   ;;  %vm107_vm1 = vcmask 31744   ;;  %v788_v6 = vmov 0   ;;  %s982_s0 = inlined_call_operand.vmem [shape: f32[4,8], index: 0, kind: input, shape index: {}]   ;;  %s983_s1 = inlined_call_operand.vmem [shape: bf16[128,4], index: 1, kind: input, shape index: {}]   ;;  %s984_s2 = inlined_call_operand.vmem [shape: f32[128,2], index: 2, kind: input, shape index: {}]   ;;  %s985_s3 = inlined_call_operand.vmem [shape: bf16[128,128], index: 3, kind: input, shape index: {}]   ;;  %s986_s4 = inlined_call_operand.vmem [shape: bf16[2,128], index: 4, kind: input, shape index: {}]   ;;  %s987_s5 = inlined_call_operand.vmem [shape: f32[2,1], index: 5, kind: input, shape index: {}]   ;;  %s988_s6 = inlined_call_operand.hbm [shape: f32[2,8], index: 6, kind: output, shape index: {}]  }
   0x1   :  { %v25_v0 = vld [vmem:[%s982_s0] sm:$0xf]  ;;  %v749_v4 = vld [vmem:[%s983_s1 + $0x8] sm:$0xff]   ;;  %v750_v5 = vld [vmem:[%s983_s1 + $0x10] sm:$0xff]   ;;  %742 = vset.pattern.permute.xlu0 %v788_v6  ;;  %743 = vset.pattern.permute.xlu1 %v788_v6 }
   0x2   :  { %v748_v1 = vld [vmem:[%s983_s1] sm:$0xff]   ;;  %v26_v2 = vpack.c.bf16 %v25_v0, %v25_v0  ;;  %v28_v8 = vld [vmem:[%s984_s2 + $0x8] sm:$0xff]  ;;  %v29_v10 = vld [vmem:[%s984_s2 + $0x10] sm:$0xff] }
   0x3   :  { %668 = vmatprep.mubr.msk.bf16.mxu0 %vm107_vm1, %v748_v1  ;;  %v27_v7 = vld [vmem:[%s984_s2] sm:$0xff]  ;;  %v30_v11 = vld [vmem:[%s984_s2 + $0x18] sm:$0xff]  ;;  %v32_v13 = vld [vmem:[%s984_s2 + $0x28] sm:$0xff] }
   0x4   :  { %736 = vmatprep.subr.msk.bf16.mxu0 %vm132_vm0, %v26_v2  ;;  %v134_v3 = vsel %vm132_vm0, %v26_v2, 0  ;;  %v43_v9 = vpack.c.bf16 %v28_v8, %v27_v7  ;;  %v31_v12 = vld [vmem:[%s984_s2 + $0x20] sm:$0xff]  ;;  %v751_v14 = vld [vmem:[%s983_s1 + $0x18] sm:$0xff]   ;;  %v44_v15 = vpack.c.bf16 %v30_v11, %v29_v10  ;;  %v33_v17 = vld [vmem:[%s984_s2 + $0x30] sm:$0xff] }
   0x5   :  { %667 = vmatpush3.bf16.msra.mxu0 %v134_v3  ;;  %v45_v16 = vpack.c.bf16 %v32_v13, %v31_v12  ;;  %v34_v18 = vld [vmem:[%s984_s2 + $0x38] sm:$0xff]  ;;  %v752_v19 = vld [vmem:[%s983_s1 + $0x20] sm:$0xff]   ;;  %v36_v21 = vld [vmem:[%s984_s2 + $0x48] sm:$0xff] }
   0x6   :  { %243 = vperm.xlu0 %742, %v43_v9   ;;  %v35_v20 = vld [vmem:[%s984_s2 + $0x40] sm:$0xff]  ;;  %v46_v22 = vpack.c.bf16 %v34_v18, %v33_v17  ;;  %v37_v23 = vld [vmem:[%s984_s2 + $0x50] sm:$0xff]  ;;  %v38_v24 = vld [vmem:[%s984_s2 + $0x58] sm:$0xff] }
   0x7   :  { %253 = vperm.xlu1 %743, %v45_v16   ;;  %v39_v25 = vld [vmem:[%s984_s2 + $0x60] sm:$0xff]  ;;  %v40_v26 = vld [vmem:[%s984_s2 + $0x68] sm:$0xff]  ;;  %v47_v27 = vpack.c.bf16 %v36_v21, %v35_v20  ;;  %v41_v28 = vld [vmem:[%s984_s2 + $0x70] sm:$0xff]  ;;  %v48_v30 = vpack.c.bf16 %v38_v24, %v37_v23 }
   0x8   :  { %669 = vmatmul.mubr.msk.bf16.vlgmr.msra.gmra.mrb[0].mxu0 %vm107_vm1, %v749_v4  ;;  %v42_v29 = vld [vmem:[%s984_s2 + $0x78] sm:$0xff]  ;;  %v753_v31 = vld [vmem:[%s983_s1 + $0x28] sm:$0xff]   ;;  %v49_v32 = vpack.c.bf16 %v40_v26, %v39_v25 }
   0x9   :  { %672 = vmatprep.mubr.msk.bf16.mxu0 %vm107_vm1, %v750_v5 }
   0xa   :  { %248 = vperm.xlu0 %742, %v44_v15  }
   0xb   :  { %258 = vperm.xlu1 %743, %v46_v22  }
   0xe   :  { %263 = vperm.xlu0 %742, %v47_v27  }
  0x10   :  { %673 = vmatmul.mubr.msk.bf16.gmra.mrb[4].mxu0 %vm107_vm1, %v751_v14 }
  0x11   :  { %676 = vmatprep.mubr.msk.bf16.mxu0 %vm107_vm1, %v752_v19 }
  0x12   :  { %11 = vsyncpa [#allocation5], 0  ;;  %v754_v33 = vld [vmem:[%s983_s1 + $0x30] sm:$0xff]   ;;  %268 = vperm.xlu1 %743, %v48_v30   ;;  %v50_v34 = vpack.c.bf16 %v42_v29, %v41_v28  ;;  %273 = vperm.xlu0 %742, %v49_v32   ;;  %v755_v35 = vld [vmem:[%s983_s1 + $0x38] sm:$0xff]   ;;  %v789_v37 = vmov 1   ;;  %vm791_vm2 = vmmov 0  }
  0x13   :  { %v756_v36 = vld [vmem:[%s985_s3] sm:$0xff]   ;;  %v757_v23 = vld [vmem:[%s985_s3 + $0x8] sm:$0xff]   ;;  %v758_v24 = vld [vmem:[%s985_s3 + $0x10] sm:$0xff]   ;;  %s792_s12 = smov [#allocation4]  }
  0x14   :  { %700 = vmatprep.mubr.bf16.mxu1 %v756_v36  ;;  %v759_v25 = vld [vmem:[%s985_s3 + $0x18] sm:$0xff]   ;;  %v760_v26 = vld [vmem:[%s985_s3 + $0x20] sm:$0xff]   ;;  %v762_v28 = vld [vmem:[%s985_s3 + $0x30] sm:$0xff]   ;;  %s600_s13 = sshll.u32 %s792_s12, 4  ;;  %s601_s13 = int_to_ptr.vmem [resolvable:$true] %s600_s13 }
  0x15   :  { %v763_v29 = vld [vmem:[%s985_s3 + $0x38] sm:$0xff]   ;;  %s764_s14 = scalar_lea.vmem %s601_s13, 32  ;;  %p769_p1 = scmp.lt.s32.totalorder %s601_s13, %s601_s13 }
  0x16   :  { %278 = vperm.xlu1 %743, %v50_v34   ;;  %744 = vset.pattern.permute.xlu0 %v789_v37  ;;  %p765_p0 = scmp.ne.s32.totalorder %s601_s13, %s764_s14  ;;  %p770_p2 = scmp.lt.s32.totalorder %s764_s14, %s764_s14 }
  0x17   :  { %483 = vperm.xlu0 %744, %v43_v9  }
  0x18   :  { %677 = vmatmul.mubr.msk.bf16.gmra.mrb[8].mxu0 %vm107_vm1, %v753_v31  ;;  %v547_v31 = vld [vmem:[%s987_s5] sm:$0x3]  ;;  %p771_p3 = por %p770_p2, %p769_p1 }
  0x19   :  { %680 = vmatprep.mubr.msk.bf16.mxu0 %vm107_vm1, %v754_v33 }
  0x1a   :  { %745 = vset.pattern.permute.xlu1 %v789_v37  ;;  %p772_p4 = pnand %p771_p3, %p765_p0 }
  0x1b   :  { %487 = vperm.xlu1 %745, %v44_v15   ;;  %495 = vperm.xlu0 %744, %v46_v22  }
  0x1f   :  { %491 = vperm.xlu1 %745, %v45_v16   ;;  %503 = vperm.xlu0 %744, %v48_v30   ;;  %v790_v30 = vmov 0.0  }
  0x20   :  { %681 = vmatmul.mubr.msk.bf16.gmra.mrb[12].mxu0 %vm107_vm1, %v755_v35  ;;  %716 = vmatprep.subr.bf16.mxu0 %v790_v30 }
  0x21   :  { %732 = vmatprep.mubr.msk.bf16.mxu0 %vm791_vm2, %v790_v30 }
  0x23   :  { %499 = vperm.xlu1 %745, %v47_v27   ;;  %511 = vperm.xlu0 %744, %v50_v34   ;;  %v761_v27 = vld [vmem:[%s985_s3 + $0x28] sm:$0xff]  }
  0x27   :  { %507 = vperm.xlu1 %745, %v49_v32   ;;  %747 = vset.pattern.permute.xlu0 %v788_v6 }
  0x2b   :  { %746 = vset.pattern.permute.xlu1 %v788_v6 }
  0x2c   :  { %550 = vperm.xlu1 %746, %v547_v31  }
  0x85   :  { %v244_v38 = vpop.permute.xlu0 %243 }
  0x86   :  { %v254_v48 = vpop.permute.xlu1 %253 }
  0x89   :  { %v249_v45 = vpop.permute.xlu0 %248 }
  0x8a   :  { %v259_v57 = vpop.permute.xlu1 %258 }
  0x8d   :  { %v264_v4 = vpop.permute.xlu0 %263 }
  0x91   :  { %v269_v5 = vpop.permute.xlu1 %268  ;;  %v274_v17 = vpop.permute.xlu0 %273 }
  0x95   :  { %v279_v18 = vpop.permute.xlu1 %278 }
  0xdb   :  { %v670_v39 = vpop.f32.mrb[0].mxu0 }
  0xdc   :  { %v170_v40 = vpop.f32.mrb[1].mxu0 }
  0xdd   :  { %v671_v41 = vpop.f32.mrb[2].mxu0 }
  0xde   :  { %v234_v42 = vpack.c.bf16 %v671_v41, %v670_v39  ;;  %v173_v43 = vpop.f32.mrb[3].mxu0 }
  0xdf   :  { %v233_v44 = vpack.c.bf16 %v173_v43, %v170_v40  ;;  %v488_v40 = vpop.permute.xlu1 %487 }
  0xe0   :  { %v282_v46 = vadd.bf16 %v249_v45, %v234_v42 }
  0xe1   :  { %v281_v47 = vadd.bf16 %v244_v38, %v233_v44  ;;  %v484_v38 = vpop.permute.xlu0 %483 }
  0xe2   :  { %v290_v53 = vmax.bf16 %v788_v6, %v282_v46 }
  0xe3   :  { %v674_v49 = vpop.f32.mrb[4].mxu0  ;;  %v289_v50 = vmax.bf16 %v788_v6, %v281_v47 }
  0xe4   :  { %v186_v51 = vpop.f32.mrb[5].mxu0 }
  0xe5   :  { %v675_v52 = vpop.f32.mrb[6].mxu0  ;;  %684 = vmatprep.subr.bf16.mxu1 %v289_v50 }
  0xe6   :  { %v236_v54 = vpack.c.bf16 %v675_v52, %v674_v49  ;;  %v189_v55 = vpop.f32.mrb[7].mxu0  ;;  %685 = vmatpush3.bf16.msra.mxu1 %v289_v50  ;;  %v492_v50 = vpop.permute.xlu1 %491 }
  0xe7   :  { %v235_v56 = vpack.c.bf16 %v189_v55, %v186_v51  ;;  %686 = vmatprep.subr.bf16.mxu1 %v290_v53  ;;  %v496_v52 = vpop.permute.xlu0 %495 }
  0xe8   :  { %v284_v58 = vadd.bf16 %v259_v57, %v236_v54 }
  0xe9   :  { %v283_v59 = vadd.bf16 %v254_v48, %v235_v56 }
  0xea   :  { %687 = vmatpush3.bf16.msra.mxu1 %v290_v53  ;;  %v292_v0 = vmax.bf16 %v788_v6, %v284_v58 }
  0xeb   :  { %v678_v60 = vpop.f32.mrb[8].mxu0  ;;  %v291_v61 = vmax.bf16 %v788_v6, %v283_v59 }
  0xec   :  { %v202_v62 = vpop.f32.mrb[9].mxu0 }
  0xed   :  { %v679_v63 = vpop.f32.mrb[10].mxu0  ;;  %688 = vmatprep.subr.bf16.mxu1 %v291_v61 }
  0xee   :  { %v238_v1 = vpack.c.bf16 %v679_v63, %v678_v60  ;;  %v205_v2 = vpop.f32.mrb[11].mxu0  ;;  %689 = vmatpush3.bf16.msra.mxu1 %v291_v61 }
  0xef   :  { %v237_v3 = vpack.c.bf16 %v205_v2, %v202_v62  ;;  %690 = vmatprep.subr.bf16.mxu1 %v292_v0  ;;  %v500_v62 = vpop.permute.xlu1 %499 }
  0xf0   :  { %v286_v7 = vadd.bf16 %v269_v5, %v238_v1 }
  0xf1   :  { %v285_v8 = vadd.bf16 %v264_v4, %v237_v3 }
  0xf2   :  { %691 = vmatpush3.bf16.msra.mxu1 %v292_v0  ;;  %v294_v13 = vmax.bf16 %v788_v6, %v286_v7  ;;  %v504_v0 = vpop.permute.xlu0 %503 }
  0xf3   :  { %v682_v9 = vpop.f32.mrb[12].mxu0  ;;  %v293_v10 = vmax.bf16 %v788_v6, %v285_v8 }
  0xf4   :  { %v218_v11 = vpop.f32.mrb[13].mxu0 }
  0xf5   :  { %v683_v12 = vpop.f32.mrb[14].mxu0  ;;  %692 = vmatprep.subr.bf16.mxu1 %v293_v10 }
  0xf6   :  { %v240_v14 = vpack.c.bf16 %v683_v12, %v682_v9  ;;  %v221_v15 = vpop.f32.mrb[15].mxu0  ;;  %693 = vmatpush3.bf16.msra.mxu1 %v293_v10 }
  0xf7   :  { %v239_v16 = vpack.c.bf16 %v221_v15, %v218_v11  ;;  %694 = vmatprep.subr.bf16.mxu1 %v294_v13  ;;  %v508_v11 = vpop.permute.xlu1 %507 }
  0xf8   :  { %v288_v19 = vadd.bf16 %v279_v18, %v240_v14 }
  0xf9   :  { %v287_v20 = vadd.bf16 %v274_v17, %v239_v16  ;;  %v538_v17 = vld [vmem:[%s986_s4] sm:$0x1] }
  0xfa   :  { %695 = vmatpush3.bf16.msra.mxu1 %v294_v13  ;;  %v296_v22 = vmax.bf16 %v788_v6, %v288_v19  ;;  %v512_v13 = vpop.permute.xlu0 %511 }
  0xfb   :  { %v295_v21 = vmax.bf16 %v788_v6, %v287_v20  ;;  %v551_v18 = vpop.permute.xlu1 %550 }
  0xfd   :  { %696 = vmatprep.subr.bf16.mxu1 %v295_v21 }
  0xfe   :  { %697 = vmatpush3.bf16.msra.mxu1 %v295_v21 }
  0xff   :  { %698 = vmatprep.subr.bf16.mxu1 %v296_v22 }
 0x102   :  { %699 = vmatpush3.bf16.msra.mxu1 %v296_v22 }
 0x105   :  { %701 = vmatmul.mubr.bf16.vlgmr.msra.gmra.mrb[0].mxu1 %v757_v23 }
 0x106   :  { %704 = vmatprep.mubr.bf16.mxu1 %v758_v24 }
 0x10d   :  { %705 = vmatmul.mubr.bf16.gmra.mrb[4].mxu1 %v759_v25 }
 0x10e   :  { %708 = vmatprep.mubr.bf16.mxu1 %v760_v26 }
 0x115   :  { %709 = vmatmul.mubr.bf16.gmra.mrb[8].mxu1 %v761_v27 }
 0x116   :  { %712 = vmatprep.mubr.bf16.mxu1 %v762_v28 }
 0x11d   :  { %713 = vmatmul.mubr.bf16.gmra.mrb[12].mxu1 %v763_v29 }
 0x1d8   :  { %v702_v32 = vpop.f32.mrb[0].mxu1 }
 0x1d9   :  { %v411_v33 = vpop.f32.mrb[1].mxu1 }
 0x1da   :  { %v703_v34 = vpop.f32.mrb[2].mxu1 }
 0x1db   :  { %v475_v35 = vpack.c.bf16 %v703_v34, %v702_v32  ;;  %v414_v36 = vpop.f32.mrb[3].mxu1 }
 0x1dc   :  { %v474_v37 = vpack.c.bf16 %v414_v36, %v411_v33 }
 0x1dd   :  { %v515_v41 = vadd.bf16 %v488_v40, %v475_v35 }
 0x1de   :  { %v514_v39 = vadd.bf16 %v484_v38, %v474_v37 }
 0x1df   :  { %v523_v48 = vmax.bf16 %v788_v6, %v515_v41 }
 0x1e0   :  { %v522_v42 = vmax.bf16 %v788_v6, %v514_v39  ;;  %v706_v43 = vpop.f32.mrb[4].mxu1 }
 0x1e1   :  { %v427_v44 = vpop.f32.mrb[5].mxu1 }
 0x1e2   :  { %v707_v45 = vpop.f32.mrb[6].mxu1  ;;  %717 = vmatpush3.bf16.msra.mxu0 %v522_v42 }
 0x1e3   :  { %v477_v46 = vpack.c.bf16 %v707_v45, %v706_v43  ;;  %v430_v47 = vpop.f32.mrb[7].mxu1  ;;  %718 = vmatprep.subr.bf16.mxu0 %v790_v30 }
 0x1e4   :  { %v476_v49 = vpack.c.bf16 %v430_v47, %v427_v44 }
 0x1e5   :  { %v517_v53 = vadd.bf16 %v496_v52, %v477_v46 }
 0x1e6   :  { %v516_v51 = vadd.bf16 %v492_v50, %v476_v49  ;;  %719 = vmatpush3.bf16.msra.mxu0 %v523_v48 }
 0x1e7   :  { %720 = vmatprep.subr.bf16.mxu0 %v790_v30  ;;  %v525_v60 = vmax.bf16 %v788_v6, %v517_v53 }
 0x1e8   :  { %v524_v54 = vmax.bf16 %v788_v6, %v516_v51  ;;  %v710_v55 = vpop.f32.mrb[8].mxu1 }
 0x1e9   :  { %v443_v56 = vpop.f32.mrb[9].mxu1 }
 0x1ea   :  { %v711_v57 = vpop.f32.mrb[10].mxu1  ;;  %721 = vmatpush3.bf16.msra.mxu0 %v524_v54 }
 0x1eb   :  { %v479_v58 = vpack.c.bf16 %v711_v57, %v710_v55  ;;  %v446_v59 = vpop.f32.mrb[11].mxu1  ;;  %722 = vmatprep.subr.bf16.mxu0 %v790_v30 }
 0x1ec   :  { %v478_v61 = vpack.c.bf16 %v446_v59, %v443_v56 }
 0x1ed   :  { %v519_v1 = vadd.bf16 %v504_v0, %v479_v58 }
 0x1ee   :  { %v518_v63 = vadd.bf16 %v500_v62, %v478_v61  ;;  %723 = vmatpush3.bf16.msra.mxu0 %v525_v60 }
 0x1ef   :  { %724 = vmatprep.subr.bf16.mxu0 %v790_v30  ;;  %v527_v9 = vmax.bf16 %v788_v6, %v519_v1 }
 0x1f0   :  { %v526_v2 = vmax.bf16 %v788_v6, %v518_v63  ;;  %v714_v3 = vpop.f32.mrb[12].mxu1 }
 0x1f1   :  { %v459_v4 = vpop.f32.mrb[13].mxu1 }
 0x1f2   :  { %v715_v5 = vpop.f32.mrb[14].mxu1  ;;  %725 = vmatpush3.bf16.msra.mxu0 %v526_v2 }
 0x1f3   :  { %v481_v7 = vpack.c.bf16 %v715_v5, %v714_v3  ;;  %v462_v8 = vpop.f32.mrb[15].mxu1  ;;  %726 = vmatprep.subr.bf16.mxu0 %v790_v30 }
 0x1f4   :  { %v480_v10 = vpack.c.bf16 %v462_v8, %v459_v4 }
 0x1f5   :  { %v521_v14 = vadd.bf16 %v512_v13, %v481_v7 }
 0x1f6   :  { %v520_v12 = vadd.bf16 %v508_v11, %v480_v10  ;;  %727 = vmatpush3.bf16.msra.mxu0 %v527_v9 }
 0x1f7   :  { %728 = vmatprep.subr.bf16.mxu0 %v790_v30  ;;  %v529_v16 = vmax.bf16 %v788_v6, %v521_v14 }
 0x1f8   :  { %v528_v15 = vmax.bf16 %v788_v6, %v520_v12 }
 0x1fa   :  { %729 = vmatpush3.bf16.msra.mxu0 %v528_v15 }
 0x1fb   :  { %730 = vmatprep.subr.bf16.mxu0 %v790_v30 }
 0x1fe   :  { %731 = vmatpush3.bf16.msra.mxu0 %v529_v16 }
 0x201   :  { %733 = vmatmul.mubr.bf16.vlgmr.msra.gmra.mrb[16].mxu0 %v538_v17 }
 0x2d4   :  { %v587_v19 = vpop.f32.mrb[16].mxu0 }
 0x2d5   :  { %v588_v20 = vadd.f32 %v587_v19, %v551_v18  ;;  %v734_v21 = vpop.f32.mrb[17].mxu0 }
 0x2d6   :  { %v590_v22 = vpop.f32.mrb[18].mxu0 }
 0x2d7   :  { %593 = vst [vmem:[#allocation4] sm:$0x3] %v588_v20  ;;  %v735_v23 = vpop.f32.mrb[19].mxu0 }
 0x2d8   :  { %775 = shalt.err (!%p772_p4)
}
 0x2d9   :  { %s776_s16 = scalar_lea.hbm %s988_s6, 32 }
 0x2da   :  { %p777_p5 = scmp.ne.s32.totalorder %s988_s6, %s776_s16  ;;  %p780_p6 = scmp.lt.u32.totalorder %s776_s16, %s988_s6 }
 0x2dc   :  { %p782_p7 = pnand %p780_p6, %p777_p5 }
 0x2de   :  { %785 = shalt.err (!%p782_p7)
}
 0x2df   :  { %603 = dma.vmem_to_hbm [thread:$0]  %s601_s13, 32, %s988_s6, [#allocation5]  }
 0x2e0   :  { %786 = dma.done.wait [#allocation5], 32  }
 0x2e1   :  { %787 = vsyncadd [#allocation5], 4294967264 }
 0x2e2   :  { %607 = vsyncpa [#allocation5], 1 }

</bundles_post_ra>
